<compile_context>
chip_gen: v6e
topology: v6e:2x2x1
jax: 0.10.0
libtpu: 0.0.40
codegen_flags: <defaults>
</compile_context>

<pallas_src>
import functools

import jax
import jax.numpy as jnp
from jax.experimental import pallas as pl
from jax.experimental.pallas import tpu as pltpu


def _hardtanh_kernel(x_ref, o_ref, *, min_val, max_val):
    # min_val / max_val are static Python floats -> fold into two VPU ops.
    o_ref[...] = jnp.clip(x_ref[...], min_val, max_val)


# Whole-slab-in-one-block threshold (bytes). Well under every generation's
# scoped VMEM default (16 MiB v5e, 32 MiB v6e/v7x).
_SINGLE_BLOCK_LIMIT = 2 << 20
# Target bytes per grid-step block for the tiled path (~1 MiB: >=85% of HBM
# roofline per measurements; 4x for double-buffered in+out = 4 MiB, safe on
# v7x's 64 MiB VMEM and v5e's 16 MiB scoped default).
_TARGET_BLOCK_BYTES = 1 << 20
_LANE = 128


def hardtanh_pallas(x, min_val, max_val):
    """Elementwise hardtanh via Pallas. x: any shape, any float dtype."""
    orig_shape = x.shape
    dtype = x.dtype
    itemsize = jnp.dtype(dtype).itemsize
    sublane = max(8, 32 // itemsize)  # 8 for f32, 16 for bf16, 32 for int8

    kernel = functools.partial(
        _hardtanh_kernel, min_val=float(min_val), max_val=float(max_val)
    )

    flat = x.reshape(-1)
    n = flat.shape[0]

    # Pad up to a lane multiple only if needed (rare for typical shapes).
    n_lane = pl.cdiv(n, _LANE) * _LANE
    padded = n_lane != n
    if padded:
        flat = jnp.pad(flat, (0, n_lane - n))

    # Pick the widest lane-dense width that divides the element count and
    # keeps at least one full sublane tile of rows (fully packed vregs).
    width = _LANE
    for w in (2048, 1024, 512, 256):
        if n_lane % w == 0 and (n_lane // w) >= sublane:
            width = w
            break
    rows = n_lane // width

    slab_bytes = n_lane * itemsize

    if slab_bytes <= _SINGLE_BLOCK_LIMIT:
        # Small input: one block == full array. No grid loop, no extra copies.
        x2d = flat.reshape(rows, width)
        out2d = pl.pallas_call(
            kernel,
            out_shape=jax.ShapeDtypeStruct((rows, width), dtype),
        )(x2d)
    else:
        # Tiled streaming path: ~1 MiB blocks, lane-dense, parallel grid.
        block_rows = max(sublane, _TARGET_BLOCK_BYTES // (width * itemsize))
        block_rows = (block_rows // sublane) * sublane
        block_rows = min(block_rows, rows)

        rows_padded = pl.cdiv(rows, block_rows) * block_rows
        if rows_padded != rows:
            # TODO(synk): ragged tail could be masked in-kernel instead of a
            # wrapper-side pad; padding here is an extra HBM pass in this case.
            flat = jnp.pad(flat, (0, (rows_padded - rows) * width))
            padded = True
        x2d = flat.reshape(rows_padded, width)

        out2d = pl.pallas_call(
            kernel,
            out_shape=jax.ShapeDtypeStruct((rows_padded, width), dtype),
            grid_spec=pltpu.PrefetchScalarGridSpec(
                num_scalar_prefetch=0,
                grid=(rows_padded // block_rows,),
                in_specs=[pl.BlockSpec((block_rows, width), lambda i: (i, 0))],
                out_specs=pl.BlockSpec((block_rows, width), lambda i: (i, 0)),
            ),
            compiler_params=pltpu.CompilerParams(
                dimension_semantics=("parallel",),
            ),
            cost_estimate=pl.CostEstimate(
                flops=2 * n,  # two compares per element
                transcendentals=0,
                bytes_accessed=2 * n * itemsize,
            ),
        )(x2d)

    out_flat = out2d.reshape(-1)
    if padded:
        out_flat = out_flat[:n]
    return out_flat.reshape(orig_shape)


if __name__ == "__main__":
    # nn.Hardtanh(min_val, max_val) parameters.
    min_val = -1.0
    max_val = 1.0

    key = jax.random.PRNGKey(0)

    # Small NCHW input consistent with the activation-test layer (single-block path).
    x_small = jax.random.normal(key, (2, 4, 16, 16), dtype=jnp.float32) * 2.0
    out_small = jax.block_until_ready(hardtanh_pallas(x_small, min_val, max_val))
    ref_small = jnp.clip(x_small, min_val, max_val)
    assert out_small.shape == x_small.shape and out_small.dtype == x_small.dtype
    assert jnp.allclose(out_small, ref_small), "small-input mismatch vs reference"

    # Larger input to exercise the tiled (gridded) path.
    x_big = jax.random.normal(key, (8, 32, 64, 64), dtype=jnp.float32) * 2.0
    out_big = jax.block_until_ready(hardtanh_pallas(x_big, min_val, max_val))
    ref_big = jnp.clip(x_big, min_val, max_val)
    assert out_big.shape == x_big.shape and out_big.dtype == x_big.dtype
    assert jnp.allclose(out_big, ref_big), "large-input mismatch vs reference"

    # Ragged element count (not a multiple of 128) to exercise the pad path.
    x_ragged = jax.random.normal(key, (3, 5, 7, 11), dtype=jnp.float32) * 2.0
    out_ragged = jax.block_until_ready(hardtanh_pallas(x_ragged, min_val, max_val))
    ref_ragged = jnp.clip(x_ragged, min_val, max_val)
    assert out_ragged.shape == x_ragged.shape and out_ragged.dtype == x_ragged.dtype
    assert jnp.allclose(out_ragged, ref_ragged), "ragged-input mismatch vs reference"

    print("KERNEL_OK")
</pallas_src>

<mosaic_0001>
module attributes {stable_mosaic.version = 11 : i64} {
  func.func @_hardtanh_kernel(%arg0: memref<8x256xf32, #tpu.memory_space<vmem>>, %arg1: memref<8x256xf32, #tpu.memory_space<vmem>>) attributes {dimension_semantics = [], scalar_prefetch = 0 : i64, scratch_operands = 0 : i64, tpu.core_type = #tpu.core_type<tc>} {
    %c0 = arith.constant 0 : index
    %c0_0 = arith.constant 0 : index
    %0 = vector.load %arg0[%c0, %c0_0] : memref<8x256xf32, #tpu.memory_space<vmem>>, vector<8x256xf32>
    %cst = arith.constant -1.000000e+00 : f32
    %cst_1 = arith.constant 1.000000e+00 : f32
    %1 = vector.broadcast %cst : f32 to vector<8x256xf32>
    %2 = arith.maximumf %1, %0 : vector<8x256xf32>
    %3 = vector.broadcast %cst_1 : f32 to vector<8x256xf32>
    %4 = arith.minimumf %3, %2 : vector<8x256xf32>
    %c0_2 = arith.constant 0 : index
    %c0_3 = arith.constant 0 : index
    %5 = vector.load %arg1[%c0_2, %c0_3] : memref<8x256xf32, #tpu.memory_space<vmem>>, vector<8x256xf32>
    tpu.vector_store %arg1[%c0_2, %c0_3], %4 {strides = array<i32>} : memref<8x256xf32, #tpu.memory_space<vmem>>, vector<8x256xf32>,
    return
  }
}

</mosaic_0001>

<bundles_post_ra>
// kernel: tpu_custom_call.1
= control target key start
LH: loop header
LB: loop body
LE: loop exit
PB: predicated region body
PF: predicated region fallthrough
CT: control target
= control target key end

     0   :  { %6 = vsyncpa [#allocation3], 0  ;;  %s110_s0 = inlined_call_operand.hbm [shape: f32[8,256], index: 0, kind: input, shape index: {}]   ;;  %s111_s1 = inlined_call_operand.hbm [shape: f32[8,256], index: 1, kind: output, shape index: {}]  }
   0x1   :  { %7 = vsyncpa [#allocation4], 0  ;;  %s92_s6 = smov [#allocation2]  }
   0x2   :  { %s14_s7 = sshll.u32 %s92_s6, 4  ;;  %s15_s7 = int_to_ptr.vmem [resolvable:$true] %s14_s7 }
   0x3   :  { %s56_s8 = scalar_lea.vmem %s15_s7, 256  ;;  %p61_p1 = scmp.lt.s32.totalorder %s15_s7, %s15_s7 }
   0x4   :  { %p57_p0 = scmp.ne.s32.totalorder %s15_s7, %s56_s8  ;;  %p62_p2 = scmp.lt.s32.totalorder %s56_s8, %s56_s8 }
   0x6   :  { %p63_p3 = por %p62_p2, %p61_p1 }
   0x8   :  { %p64_p4 = pnand %p63_p3, %p57_p0 }
   0xa   :  { %67 = shalt.err (!%p64_p4)
}
   0xb   :  { %17 = dma.hbm_to_vmem [thread:$0]  %s110_s0, 256, %s15_s7, [#allocation3]  }
   0xc   :  { %88 = dma.done.wait [#allocation3], 256  }
   0xd   :  { %89 = vsyncadd [#allocation3], 4294967040  ;;  %s93_s11 = smov [#allocation5]   ;;  %v21_v0 = vld [vmem:[#allocation2] sm:$0xff]  ;;  %v22_v1 = vld [vmem:[#allocation2 + $0x8] sm:$0xff] }
   0xe   :  { %s35_s12 = sshll.u32 %s93_s11, 4  ;;  %v44_v2 = vclamps-f32 %v21_v0, 1.0  ;;  %v45_v3 = vclamps-f32 %v22_v1, 1.0  ;;  %s36_s12 = int_to_ptr.vmem [resolvable:$true] %s35_s12 }
   0xf   :  { %s68_s13 = scalar_lea.vmem %s36_s12, 256  ;;  %p73_p6 = scmp.lt.s32.totalorder %s36_s12, %s36_s12 }
  0x10   :  { %27 = vst [vmem:[#allocation5] sm:$0xff] %v44_v2  ;;  %28 = vst [vmem:[#allocation5 + $0x8] sm:$0xff] %v45_v3  ;;  %p69_p5 = scmp.ne.s32.totalorder %s36_s12, %s68_s13  ;;  %p74_p7 = scmp.lt.s32.totalorder %s68_s13, %s68_s13 }
  0x12   :  { %p75_p8 = por %p74_p7, %p73_p6 }
  0x14   :  { %p76_p9 = pnand %p75_p8, %p69_p5 }
  0x16   :  { %79 = shalt.err (!%p76_p9)
}
  0x17   :  { %38 = dma.vmem_to_hbm [thread:$0]  %s36_s12, 256, %s111_s1, [#allocation4]  }
  0x18   :  { %90 = dma.done.wait [#allocation4], 256  }
  0x19   :  { %91 = vsyncadd [#allocation4], 4294967040 }
  0x1a   :  { %42 = vsyncpa [#allocation3], 1 }
  0x1b   :  { %43 = vsyncpa [#allocation4], 1 }

</bundles_post_ra>
